<compile_context>
chip_gen: v7x
topology: tpu7x:2x2x1
jax: 0.10.0
libtpu: 0.0.40
codegen_flags: <defaults>
</compile_context>

<pallas_src>
import functools

import jax
import jax.numpy as jnp
from jax.experimental import pallas as pl
from jax.experimental.pallas import tpu as pltpu


def _rmsnorm_kernel(x_ref, scale_ref, bias_ref, o_ref, *, eps):
    # x_ref: (tile_rows, hidden); scale_ref / bias_ref: (1, hidden)
    x = x_ref[...].astype(jnp.float32)
    ms = jnp.mean(x * x, axis=-1, keepdims=True)            # (tile_rows, 1)
    inv_rms = jax.lax.rsqrt(ms + eps)                        # (tile_rows, 1)
    scale = scale_ref[...].astype(jnp.float32)               # (1, hidden)
    bias = bias_ref[...].astype(jnp.float32)                 # (1, hidden)
    y = x * inv_rms * scale + bias
    o_ref[...] = y.astype(o_ref.dtype)


def _sublane_pack(dtype) -> int:
    """Rows per packed sublane tile: 8 for 4-byte, 16 for 2-byte, 32 for 1-byte."""
    itemsize = jnp.dtype(dtype).itemsize
    return 8 * max(1, 4 // itemsize)


def _pick_tile_rows(n_rows, hidden, dtype, target_block_bytes):
    """Largest row tile that is a multiple of the dtype's sublane packing and
    keeps one block around target_block_bytes."""
    pack = _sublane_pack(dtype)
    itemsize = jnp.dtype(dtype).itemsize
    row_bytes = max(1, hidden * itemsize)
    tile = max(pack, target_block_bytes // row_bytes)
    tile = (tile // pack) * pack
    # No point in a tile larger than the sublane-rounded-up row count.
    tile = min(tile, pl.cdiv(n_rows, pack) * pack)
    return max(pack, tile)


def _default_block_and_vmem_bytes():
    """Conservative (v7x-safe) defaults; bigger tiles on 128-MiB-VMEM parts."""
    try:
        kind = jax.devices()[0].device_kind.lower()
    except Exception:  # pragma: no cover - defensive
        kind = ""
    if ("v5" in kind) or ("v6" in kind):
        # 128 MiB physical VMEM: bigger tiles shave per-grid-step overhead.
        return 8 * 1024 * 1024, 80 * 1024 * 1024
    # v7x (64 MiB physical VMEM per TC) or unknown: stay conservative.  2 MiB
    # tiles sit at ~85% of the HBM roofline and leave headroom for the
    # bf16->f32 temporaries the kernel materializes per live tile.
    return 2 * 1024 * 1024, 48 * 1024 * 1024


def rmsnorm(
    x,
    scale,
    bias,
    *,
    axis=-1,
    eps=1e-8,
    target_block_bytes=None,
    vmem_limit_bytes=None,
):
    """RMSNorm over the last axis. x: (..., hidden); scale/bias: (hidden,)."""
    if axis < 0:
        axis += x.ndim
    assert axis == x.ndim - 1, "kernel implements normalization over the last axis"

    default_block, default_vmem = _default_block_and_vmem_bytes()
    if target_block_bytes is None:
        target_block_bytes = default_block
    if vmem_limit_bytes is None:
        vmem_limit_bytes = default_vmem

    orig_shape = x.shape
    hidden = orig_shape[-1]
    x2d = x.reshape(-1, hidden)
    n_rows = x2d.shape[0]

    tile_rows = _pick_tile_rows(n_rows, hidden, x.dtype, target_block_bytes)
    # No padding: rely on Pallas partial-edge-block handling.  OOB rows in the
    # last block are read as uninitialized data, normalized independently, and
    # their stores are masked — valid rows are never affected.
    n_blocks = pl.cdiv(n_rows, tile_rows)

    scale2d = scale.reshape(1, hidden)
    bias2d = bias.reshape(1, hidden)

    kernel = functools.partial(_rmsnorm_kernel, eps=eps)

    out2d = pl.pallas_call(
        kernel,
        out_shape=jax.ShapeDtypeStruct((n_rows, hidden), x.dtype),
        grid_spec=pltpu.PrefetchScalarGridSpec(
            num_scalar_prefetch=0,
            grid=(n_blocks,),
            in_specs=[
                pl.BlockSpec((tile_rows, hidden), lambda i: (i, 0)),
                pl.BlockSpec((1, hidden), lambda i: (0, 0)),   # resident: const index
                pl.BlockSpec((1, hidden), lambda i: (0, 0)),   # resident: const index
            ],
            out_specs=pl.BlockSpec((tile_rows, hidden), lambda i: (i, 0)),
        ),
        compiler_params=pltpu.CompilerParams(
            # TODO(synk): confirm both v7x TensorCores run grid steps; switch to
            # pltpu.CORE_PARALLEL if "parallel" alone does not shard across TCs.
            dimension_semantics=("parallel",),
            vmem_limit_bytes=vmem_limit_bytes,
        ),
    )(x2d, scale2d, bias2d)

    return out2d.reshape(orig_shape)


def _reference(x, scale, bias, eps):
    xf = x.astype(jnp.float32)
    rms = jnp.sqrt(jnp.mean(xf * xf, axis=-1, keepdims=True) + eps)
    return (xf / rms * scale.astype(jnp.float32) + bias.astype(jnp.float32)).astype(x.dtype)


if __name__ == "__main__":
    eps = 1e-8
    key = jax.random.PRNGKey(0)
    kx, ks, kb, kx2, ks2, kb2, kx3, ks3, kb3 = jax.random.split(key, 9)

    # --- primary small-shape test (matches the module: batch=2, seq=8, hidden=32) ---
    batch, seq, hidden = 2, 8, 32
    x = jax.random.normal(kx, (batch, seq, hidden), dtype=jnp.float32)
    # Deterministic parameter init mirroring nn.init.normal_(std=0.02).
    scale = 0.02 * jax.random.normal(ks, (hidden,), dtype=jnp.float32)
    bias = 0.02 * jax.random.normal(kb, (hidden,), dtype=jnp.float32)

    out = rmsnorm(x, scale, bias, axis=-1, eps=eps)
    out = jax.block_until_ready(out)

    ref = _reference(x, scale, bias, eps)
    assert out.shape == x.shape and out.dtype == x.dtype
    assert jnp.allclose(out, ref, atol=1e-5, rtol=1e-5)

    # --- secondary test: bf16 input, ragged row count (300 rows) exercising the
    #     partial-edge-block path with no wrapper-side pad/slice ---
    b2, s2, h2 = 3, 100, 256
    x2 = jax.random.normal(kx2, (b2, s2, h2), dtype=jnp.float32).astype(jnp.bfloat16)
    scale2 = (0.02 * jax.random.normal(ks2, (h2,), dtype=jnp.float32)).astype(jnp.bfloat16)
    bias2 = (0.02 * jax.random.normal(kb2, (h2,), dtype=jnp.float32)).astype(jnp.bfloat16)

    out2 = rmsnorm(x2, scale2, bias2, axis=-1, eps=eps)
    out2 = jax.block_until_ready(out2)

    ref2 = _reference(x2, scale2, bias2, eps)
    assert out2.shape == x2.shape and out2.dtype == x2.dtype
    assert jnp.allclose(out2.astype(jnp.float32), ref2.astype(jnp.float32),
                        atol=1e-2, rtol=5e-2)

    # --- third test: force a tiny tile so many grid steps run and the last
    #     block is partial (185 rows, tile 8 -> 24 blocks, last has 1 row) ---
    b3, s3, h3 = 5, 37, 128
    x3 = jax.random.normal(kx3, (b3, s3, h3), dtype=jnp.float32)
    scale3 = 0.02 * jax.random.normal(ks3, (h3,), dtype=jnp.float32)
    bias3 = 0.02 * jax.random.normal(kb3, (h3,), dtype=jnp.float32)

    out3 = rmsnorm(x3, scale3, bias3, axis=-1, eps=eps,
                   target_block_bytes=8 * h3 * 4)
    out3 = jax.block_until_ready(out3)

    ref3 = _reference(x3, scale3, bias3, eps)
    assert out3.shape == x3.shape and out3.dtype == x3.dtype
    assert jnp.allclose(out3, ref3, atol=1e-5, rtol=1e-5)

    print("KERNEL_OK")
</pallas_src>

<mosaic_0001>
module attributes {stable_mosaic.version = 11 : i64} {
  func.func @_rmsnorm_kernel(%arg0: i32, %arg1: memref<16x32xf32, #tpu.memory_space<vmem>>, %arg2: memref<1x32xf32, #tpu.memory_space<vmem>>, %arg3: memref<1x32xf32, #tpu.memory_space<vmem>>, %arg4: memref<16x32xf32, #tpu.memory_space<vmem>>) attributes {dimension_semantics = [#tpu.dimension_semantics<parallel>], iteration_bounds = array<i64: 1>, scalar_prefetch = 0 : i64, scratch_operands = 0 : i64, tpu.core_type = #tpu.core_type<tc>, window_params = [{transform_indices = @transform_0, window_bounds = array<i64: 16, 32>}, {pipeline_mode = #tpu.pipeline_mode<synchronous>, transform_indices = @transform_1, window_bounds = array<i64: 1, 32>}, {pipeline_mode = #tpu.pipeline_mode<synchronous>, transform_indices = @transform_2, window_bounds = array<i64: 1, 32>}, {transform_indices = @transform_3, window_bounds = array<i64: 16, 32>}]} {
    %c0 = arith.constant 0 : index
    %c0_0 = arith.constant 0 : index
    %0 = vector.load %arg1[%c0, %c0_0] : memref<16x32xf32, #tpu.memory_space<vmem>>, vector<16x32xf32>
    %1 = arith.mulf %0, %0 : vector<16x32xf32>
    %cst = arith.constant dense<0.000000e+00> : vector<16xf32>
    %2 = vector.multi_reduction <add>, %1, %cst [1] : vector<16x32xf32> to vector<16xf32>
    %3 = vector.shape_cast %2 : vector<16xf32> to vector<16x1xf32>
    %cst_1 = arith.constant 3.200000e+01 : f32
    %4 = vector.broadcast %cst_1 : f32 to vector<16x1xf32>
    %5 = arith.divf %3, %4 : vector<16x1xf32>
    %cst_2 = arith.constant 9.99999993E-9 : f32
    %6 = vector.broadcast %cst_2 : f32 to vector<16x1xf32>
    %7 = arith.addf %5, %6 : vector<16x1xf32>
    %8 = math.rsqrt %7 : vector<16x1xf32>
    %c0_3 = arith.constant 0 : index
    %c0_4 = arith.constant 0 : index
    %9 = vector.load %arg2[%c0_3, %c0_4] : memref<1x32xf32, #tpu.memory_space<vmem>>, vector<1x32xf32>
    %c0_5 = arith.constant 0 : index
    %c0_6 = arith.constant 0 : index
    %10 = vector.load %arg3[%c0_5, %c0_6] : memref<1x32xf32, #tpu.memory_space<vmem>>, vector<1x32xf32>
    %11 = vector.broadcast %8 : vector<16x1xf32> to vector<16x32xf32>
    %12 = arith.mulf %0, %11 : vector<16x32xf32>
    %13 = vector.broadcast %9 : vector<1x32xf32> to vector<16x32xf32>
    %14 = arith.mulf %12, %13 : vector<16x32xf32>
    %15 = vector.broadcast %10 : vector<1x32xf32> to vector<16x32xf32>
    %16 = arith.addf %14, %15 : vector<16x32xf32>
    %c0_7 = arith.constant 0 : index
    %c0_8 = arith.constant 0 : index
    %17 = vector.load %arg4[%c0_7, %c0_8] : memref<16x32xf32, #tpu.memory_space<vmem>>, vector<16x32xf32>
    tpu.vector_store %arg4[%c0_7, %c0_8], %16 {strides = array<i32>} : memref<16x32xf32, #tpu.memory_space<vmem>>, vector<16x32xf32>,
    return
  }
  func.func @transform_0(%arg0: i32) -> (i32, i32) {
    %c0_i32 = arith.constant 0 : i32
    %c0_i32_0 = arith.constant 0 : i32
    return %arg0, %c0_i32 : i32, i32
  }
  func.func @transform_1(%arg0: i32) -> (i32, i32) {
    %c0_i32 = arith.constant 0 : i32
    %c0_i32_0 = arith.constant 0 : i32
    %c0_i32_1 = arith.constant 0 : i32
    return %c0_i32, %c0_i32_0 : i32, i32
  }
  func.func @transform_2(%arg0: i32) -> (i32, i32) {
    %c0_i32 = arith.constant 0 : i32
    %c0_i32_0 = arith.constant 0 : i32
    %c0_i32_1 = arith.constant 0 : i32
    return %c0_i32, %c0_i32_0 : i32, i32
  }
  func.func @transform_3(%arg0: i32) -> (i32, i32) {
    %c0_i32 = arith.constant 0 : i32
    %c0_i32_0 = arith.constant 0 : i32
    return %arg0, %c0_i32 : i32, i32
  }
}

</mosaic_0001>

<bundles_post_ra>
// kernel: tpu_custom_call.1
= control target key start
LH: loop header
LB: loop body
LE: loop exit
PB: predicated region body
PF: predicated region fallthrough
CT: control target
= control target key end

     0   :  { %8 = vsyncpa [#allocation3], 0  ;;  %s208_s0 = inlined_call_operand.hbm [shape: f32[16,32], index: 0, kind: input, shape index: {}]   ;;  %s209_s1 = inlined_call_operand.vmem [shape: f32[1,32], index: 1, kind: input, shape index: {}]   ;;  %s210_s2 = inlined_call_operand.vmem [shape: f32[1,32], index: 2, kind: input, shape index: {}]   ;;  %s211_s3 = inlined_call_operand.hbm [shape: f32[16,32], index: 3, kind: output, shape index: {}]  }
   0x1   :  { %9 = vsyncpa [#allocation4], 0  ;;  %s144_s12 = smov [#allocation2]   ;;  %s96_s16 = scalar_lea.hbm %s208_s0, 256 }
   0x2   :  { %s15_s13 = sshll.u32 %s144_s12, 4  ;;  %p97_p0 = scmp.ne.s32.totalorder %s208_s0, %s96_s16  ;;  %s16_s13 = int_to_ptr.vmem [resolvable:$true] %s15_s13 }
   0x3   :  { %p100_p1 = scmp.lt.u32.totalorder %s96_s16, %s208_s0 }
   0x5   :  { %p102_p2 = pnand %p100_p1, %p97_p0 }
   0x7   :  { %105 = shalt.err (!%p102_p2)
}
   0x8   :  { %s106_s21 = scalar_lea.vmem %s16_s13, 256  ;;  %p111_p4 = scmp.lt.s32.totalorder %s16_s13, %s16_s13 }
   0x9   :  { %p107_p3 = scmp.ne.s32.totalorder %s16_s13, %s106_s21  ;;  %p112_p5 = scmp.lt.s32.totalorder %s106_s21, %s106_s21 }
   0xb   :  { %p113_p6 = por %p112_p5, %p111_p4 }
   0xd   :  { %p114_p7 = pnand %p113_p6, %p107_p3 }
   0xf   :  { %117 = shalt.err (!%p114_p7)
}
  0x10   :  { %s145_s22 = smov 128   ;;  %s146_s23 = smov 8  }
  0x11   :  { %21 = dma.hbm_to_vmem [thread:$0]  %s208_s0, 256, %s16_s13, [#allocation3], %s145_s22, %s145_s22, %s146_s23  }
  0x12   :  { %140 = dma.done.wait [#allocation3], 256  }
  0x13   :  { %141 = vsyncadd [#allocation3], 4294967040  ;;  %v29_v0 = vld [vmem:[#allocation2] sm:$0xff]  ;;  %vm33_vm0 = vcmask 261120   ;;  %v30_v1 = vld [vmem:[#allocation2 + $0x8] sm:$0xff]  ;;  %s147_s29 = smov [#allocation5]  }
  0x14   :  { %v31_v2 = vmul.f32 %v29_v0, %v29_v0  ;;  %v32_v3 = vmul.f32 %v30_v1, %v30_v1  ;;  %v86_v13 = vld [vmem:[%s209_s1] ss:$0 sm:$0xff]  ;;  %s74_s30 = sshll.u32 %s147_s29, 4  ;;  %s75_s30 = int_to_ptr.vmem [resolvable:$true] %s74_s30 }
  0x15   :  { %v87_v15 = vld [vmem:[%s210_s2] ss:$0 sm:$0xff]  ;;  %s118_s4 = scalar_lea.vmem %s75_s30, 256  ;;  %p123_p9 = scmp.lt.s32.totalorder %s75_s30, %s75_s30 }
  0x16   :  { %v34_v4 = vsel %vm33_vm0, %v31_v2, 0.0  ;;  %v37_v5 = vsel %vm33_vm0, %v32_v3, 0.0  ;;  %p119_p8 = scmp.ne.s32.totalorder %s75_s30, %s118_s4  ;;  %p124_p10 = scmp.lt.s32.totalorder %s118_s4, %s118_s4 }
  0x17   :  { %35 = vadd.xlane.f32.xlu0 %v34_v4 }
  0x18   :  { %p125_p11 = por %p124_p10, %p123_p9 }
  0x1a   :  { %p126_p12 = pnand %p125_p11, %p119_p8 }
  0x1b   :  { %38 = vadd.xlane.f32.xlu0 %v37_v5 }
  0xa4   :  { %v36_v6 = vpop.xlane.xlu0 %35 }
  0xa5   :  { %v41_v7 = vmul.f32 0.03125, %v36_v6 }
  0xa7   :  { %v43_v8 = vadd.f32 1e-08, %v41_v7 }
  0xa8   :  { %v39_v9 = vpop.xlane.xlu0 %38 }
  0xa9   :  { %92 = vrsqrt.f32 %v43_v8  ;;  %v42_v10 = vmul.f32 0.03125, %v39_v9 }
  0xab   :  { %v44_v11 = vadd.f32 1e-08, %v42_v10 }
  0xad   :  { %94 = vrsqrt.f32 %v44_v11 }
  0xb3   :  { %v93_v12 = vpop.eup %92 }
  0xb4   :  { %v49_v14 = vmul.f32 %v93_v12, %v29_v0 }
  0xb6   :  { %v57_v16 = vmul.f32 %v86_v13, %v49_v14 }
  0xb7   :  { %v95_v17 = vpop.eup %94 }
  0xb8   :  { %v50_v18 = vmul.f32 %v95_v17, %v30_v1  ;;  %v65_v19 = vadd.f32 %v87_v15, %v57_v16 }
  0xba   :  { %v58_v20 = vmul.f32 %v86_v13, %v50_v18  ;;  %67 = vst.msk [vmem:[#allocation5] sm:$0xff] %vm33_vm0, %v65_v19 }
  0xbc   :  { %v66_v21 = vadd.f32 %v87_v15, %v58_v20 }
  0xbe   :  { %68 = vst.msk [vmem:[#allocation5 + $0x8] sm:$0xff] %vm33_vm0, %v66_v21 }
  0xbf   :  { %129 = shalt.err (!%p126_p12)
}
  0xc0   :  { %s130_s5 = scalar_lea.hbm %s211_s3, 256 }
  0xc1   :  { %p131_p13 = scmp.ne.s32.totalorder %s211_s3, %s130_s5  ;;  %p134_p0 = scmp.lt.u32.totalorder %s130_s5, %s211_s3 }
  0xc3   :  { %p136_p1 = pnand %p134_p0, %p131_p13 }
  0xc5   :  { %139 = shalt.err (!%p136_p1)
}
  0xc6   :  { %80 = dma.vmem_to_hbm [thread:$0]  %s75_s30, 256, %s211_s3, [#allocation4], %s145_s22, %s145_s22, %s146_s23  }
  0xc7   :  { %142 = dma.done.wait [#allocation4], 256  }
  0xc8   :  { %143 = vsyncadd [#allocation4], 4294967040 }
  0xc9   :  { %84 = vsyncpa [#allocation3], 1 }
  0xca   :  { %85 = vsyncpa [#allocation4], 1 }

</bundles_post_ra>
